<compile_context>
chip_gen: v7x
topology: tpu7x:2x2x1
jax: 0.10.0
libtpu: 0.0.40
codegen_flags: <defaults>
</compile_context>

<pallas_src>
import jax
import jax.numpy as jnp
from jax.experimental import pallas as pl
from jax.experimental.pallas import tpu as pltpu

latents = 31
hiddens = 256
actions = 3  # small action space consistent with a world-models controller

_SINGLE_STEP_MAX_ROWS = 512  # whole batch in one grid step up to this many rows


def _round_up(n, m):
    return ((n + m - 1) // m) * m


def _large_batch_tile():
    # MXU-native tile height: 128 on v5e, 256 on v6e/v7x.
    try:
        kind = jax.devices()[0].device_kind.lower()
        if "v5" in kind:
            return 128
    except Exception:
        pass
    return 256


# ---------------- MXU kernel: batched linear + softmax ----------------------
def controller_mxu_kernel(x_ref, w_ref, b_ref, o_ref):
    # x_ref: (TB, D) f32   w_ref: (D, A_pad) bf16   b_ref: (1, A_pad) f32
    # o_ref: (TB, A_pad) f32
    x = x_ref[...].astype(jnp.bfloat16)  # bf16 MXU operands, f32 accumulation
    logits = jnp.dot(x, w_ref[...], preferred_element_type=jnp.float32) + b_ref[...]
    m = jnp.max(logits, axis=-1, keepdims=True)
    e = jnp.exp(logits - m)              # padded action cols: bias=-1e30 -> exp==0
    o_ref[...] = e / jnp.sum(e, axis=-1, keepdims=True)


# ---------------- VPU/XLU kernel: single-sample latency path ----------------
def controller_vpu_kernel(x_ref, w_ref, b_ref, o_ref):
    # x_ref: (1, D)   w_ref: (8, D) with actions on sublanes   b_ref/o_ref: (8, 1)
    prod = w_ref[...] * x_ref[...]                      # sublane-broadcast of x row
    logits = jnp.sum(prod, axis=-1, keepdims=True) + b_ref[...]
    m = jnp.max(logits, axis=0, keepdims=True)
    e = jnp.exp(logits - m)                             # padded sublanes -> 0
    o_ref[...] = e / jnp.sum(e, axis=0, keepdims=True)


def make_controller_forward(weight, bias):
    """One-time param prep + jitted forward closures.

    weight: (A, D) PyTorch nn.Linear layout; bias: (A,).
    Returns (forward, forward_batch):
      forward(inputs (1,1,D)) -> (A,) probabilities   [PyTorch semantics]
      forward_batch(x (B,D))  -> (B, A) probabilities
    """
    A, D = weight.shape
    A_pad = _round_up(A, 128)
    w_f32 = jnp.asarray(weight, jnp.float32)
    b_f32 = jnp.asarray(bias, jnp.float32)

    # ---- hoisted, done exactly once ----
    # MXU path: pre-transposed, lane-padded, bf16 weight; f32 bias row with
    # -1e30 sentinel on padded action columns (softmax masks them).
    w_mxu = (
        jnp.zeros((D, A_pad), jnp.float32).at[:, :A].set(w_f32.T)
    ).astype(jnp.bfloat16)
    b_mxu = jnp.full((1, A_pad), -1e30, jnp.float32).at[0, :A].set(b_f32)

    # VPU path: actions live on sublanes -> only (8, 287) f32 ~ 9 KiB of weight.
    w_vpu = jnp.zeros((8, D), jnp.float32).at[:A, :].set(w_f32)
    b_vpu = jnp.full((8, 1), -1e30, jnp.float32).at[:A, 0].set(b_f32)

    def _run_batched(x):
        # x: (B, D) f32, unpadded along D; full-extent K block -> Mosaic pads in VMEM.
        B = x.shape[0]
        if B <= _SINGLE_STEP_MAX_ROWS:
            tb, x_in = B, x                      # one grid step, zero padding copies
        else:
            tb = _large_batch_tile()             # MXU-native tile height
            pad = (-B) % tb
            x_in = jnp.pad(x, ((0, pad), (0, 0))) if pad else x
        rows = x_in.shape[0]
        out = pl.pallas_call(
            controller_mxu_kernel,
            out_shape=jax.ShapeDtypeStruct((rows, A_pad), jnp.float32),
            grid_spec=pltpu.PrefetchScalarGridSpec(
                num_scalar_prefetch=0,
                grid=(rows // tb,),
                in_specs=[
                    pl.BlockSpec((tb, D), lambda i: (i, 0)),
                    pl.BlockSpec((D, A_pad), lambda i: (0, 0)),
                    pl.BlockSpec((1, A_pad), lambda i: (0, 0)),
                ],
                out_specs=pl.BlockSpec((tb, A_pad), lambda i: (i, 0)),
            ),
            compiler_params=pltpu.CompilerParams(
                # Only matters when the grid has >= 2 steps (large B on v7x);
                # harmless no-op for the 1-step small-batch case.
                dimension_semantics=("parallel",),
            ),
        )(x_in, w_mxu, b_mxu)
        return out[:B, :A]

    @jax.jit
    def forward(inputs):
        # PyTorch semantics: (1, 1, D) -> softmax(fc(x).squeeze(0).squeeze(0), dim=0)
        x = jnp.asarray(inputs, jnp.float32).reshape(1, D)
        probs = pl.pallas_call(
            controller_vpu_kernel,
            out_shape=jax.ShapeDtypeStruct((8, 1), jnp.float32),
            grid_spec=pltpu.PrefetchScalarGridSpec(
                num_scalar_prefetch=0,
                grid=(1,),
                in_specs=[
                    pl.BlockSpec((1, D), lambda i: (0, 0)),
                    pl.BlockSpec((8, D), lambda i: (0, 0)),
                    pl.BlockSpec((8, 1), lambda i: (0, 0)),
                ],
                out_specs=pl.BlockSpec((8, 1), lambda i: (0, 0)),
            ),
        )(x, w_vpu, b_vpu)
        return probs[:A, 0]

    @jax.jit
    def forward_batch(x):
        return _run_batched(jnp.asarray(x, jnp.float32))

    return forward, forward_batch


if __name__ == "__main__":
    key = jax.random.PRNGKey(0)
    k_x, k_w, k_b, k_xb = jax.random.split(key, 4)

    D = latents + hiddens  # 287

    # Deterministic "nn.Linear"-style init (uniform in +/- 1/sqrt(D)).
    bound = 1.0 / (D ** 0.5)
    weight = jax.random.uniform(k_w, (actions, D), jnp.float32, -bound, bound)
    bias = jax.random.uniform(k_b, (actions,), jnp.float32, -bound, bound)

    forward, forward_batch = make_controller_forward(weight, bias)

    # --- single-sample path (matches the PyTorch module's forward, f32 VPU) ---
    x = jax.random.normal(k_x, (1, 1, D), jnp.float32)
    probs = jax.block_until_ready(forward(x))

    ref = jax.nn.softmax(x.reshape(1, D) @ weight.T + bias, axis=-1).reshape(actions)
    assert probs.shape == (actions,)
    assert jnp.allclose(probs, ref, atol=1e-4), (probs, ref)
    assert abs(float(jnp.sum(probs)) - 1.0) < 1e-5

    # --- batched path (bf16 MXU, amortizes dispatch across timesteps/rollouts) ---
    B = 16
    xb = jax.random.normal(k_xb, (B, D), jnp.float32)
    probs_b = jax.block_until_ready(forward_batch(xb))
    ref_b = jax.nn.softmax(xb @ weight.T + bias, axis=-1)
    assert probs_b.shape == (B, actions)
    # bf16 matmul operands -> ~1e-3-level logit error; probabilities within 1e-2.
    assert jnp.allclose(probs_b, ref_b, atol=1e-2), (probs_b, ref_b)
    assert jnp.allclose(jnp.sum(probs_b, axis=-1), 1.0, atol=1e-5)

    print("KERNEL_OK")
</pallas_src>

<mosaic_0001>
module attributes {stable_mosaic.version = 11 : i64} {
  func.func @controller_vpu_kernel(%arg0: i32, %arg1: memref<1x287xf32, #tpu.memory_space<vmem>>, %arg2: memref<8x287xf32, #tpu.memory_space<vmem>>, %arg3: memref<8x1xf32, #tpu.memory_space<vmem>>, %arg4: memref<8x1xf32, #tpu.memory_space<vmem>>) attributes {dimension_semantics = [#tpu.dimension_semantics<arbitrary>], iteration_bounds = array<i64: 1>, scalar_prefetch = 0 : i64, scratch_operands = 0 : i64, tpu.core_type = #tpu.core_type<tc>, window_params = [{pipeline_mode = #tpu.pipeline_mode<synchronous>, transform_indices = @transform_0, window_bounds = array<i64: 1, 287>}, {pipeline_mode = #tpu.pipeline_mode<synchronous>, transform_indices = @transform_1, window_bounds = array<i64: 8, 287>}, {pipeline_mode = #tpu.pipeline_mode<synchronous>, transform_indices = @transform_2, window_bounds = array<i64: 8, 1>}, {pipeline_mode = #tpu.pipeline_mode<synchronous>, transform_indices = @transform_3, window_bounds = array<i64: 8, 1>}]} {
    %c0 = arith.constant 0 : index
    %c0_0 = arith.constant 0 : index
    %0 = vector.load %arg2[%c0, %c0_0] : memref<8x287xf32, #tpu.memory_space<vmem>>, vector<8x287xf32>
    %c0_1 = arith.constant 0 : index
    %c0_2 = arith.constant 0 : index
    %1 = vector.load %arg1[%c0_1, %c0_2] : memref<1x287xf32, #tpu.memory_space<vmem>>, vector<1x287xf32>
    %2 = vector.broadcast %1 : vector<1x287xf32> to vector<8x287xf32>
    %3 = arith.mulf %0, %2 : vector<8x287xf32>
    %cst = arith.constant dense<0.000000e+00> : vector<8xf32>
    %4 = vector.multi_reduction <add>, %3, %cst [1] : vector<8x287xf32> to vector<8xf32>
    %5 = vector.shape_cast %4 : vector<8xf32> to vector<8x1xf32>
    %c0_3 = arith.constant 0 : index
    %c0_4 = arith.constant 0 : index
    %6 = vector.load %arg3[%c0_3, %c0_4] : memref<8x1xf32, #tpu.memory_space<vmem>>, vector<8x1xf32>
    %7 = arith.addf %5, %6 : vector<8x1xf32>
    %cst_5 = arith.constant dense<0xFF800000> : vector<1xf32>
    %8 = vector.multi_reduction <maximumf>, %7, %cst_5 [0] : vector<8x1xf32> to vector<1xf32>
    %9 = vector.shape_cast %8 : vector<1xf32> to vector<1x1xf32>
    %10 = vector.broadcast %9 : vector<1x1xf32> to vector<8x1xf32>
    %11 = arith.subf %7, %10 : vector<8x1xf32>
    %12 = math.exp %11 : vector<8x1xf32>
    %cst_6 = arith.constant dense<0.000000e+00> : vector<1xf32>
    %13 = vector.multi_reduction <add>, %12, %cst_6 [0] : vector<8x1xf32> to vector<1xf32>
    %14 = vector.shape_cast %13 : vector<1xf32> to vector<1x1xf32>
    %15 = vector.broadcast %14 : vector<1x1xf32> to vector<8x1xf32>
    %16 = arith.divf %12, %15 : vector<8x1xf32>
    %c0_7 = arith.constant 0 : index
    %c0_8 = arith.constant 0 : index
    %17 = vector.load %arg4[%c0_7, %c0_8] : memref<8x1xf32, #tpu.memory_space<vmem>>, vector<8x1xf32>
    tpu.vector_store %arg4[%c0_7, %c0_8], %16 {strides = array<i32>} : memref<8x1xf32, #tpu.memory_space<vmem>>, vector<8x1xf32>,
    return
  }
  func.func @transform_0(%arg0: i32) -> (i32, i32) {
    %c0_i32 = arith.constant 0 : i32
    %c0_i32_0 = arith.constant 0 : i32
    %c0_i32_1 = arith.constant 0 : i32
    return %c0_i32, %c0_i32_0 : i32, i32
  }
  func.func @transform_1(%arg0: i32) -> (i32, i32) {
    %c0_i32 = arith.constant 0 : i32
    %c0_i32_0 = arith.constant 0 : i32
    %c0_i32_1 = arith.constant 0 : i32
    return %c0_i32, %c0_i32_0 : i32, i32
  }
  func.func @transform_2(%arg0: i32) -> (i32, i32) {
    %c0_i32 = arith.constant 0 : i32
    %c0_i32_0 = arith.constant 0 : i32
    %c0_i32_1 = arith.constant 0 : i32
    return %c0_i32, %c0_i32_0 : i32, i32
  }
  func.func @transform_3(%arg0: i32) -> (i32, i32) {
    %c0_i32 = arith.constant 0 : i32
    %c0_i32_0 = arith.constant 0 : i32
    %c0_i32_1 = arith.constant 0 : i32
    return %c0_i32, %c0_i32_0 : i32, i32
  }
}

</mosaic_0001>

<bundles_post_ra>
// kernel: forward.1
= control target key start
LH: loop header
LB: loop body
LE: loop exit
PB: predicated region body
PF: predicated region fallthrough
CT: control target
= control target key end

     0   :  { %8 = vsyncpa [#allocation3], 0  ;;  %s112_s12 = smov [#allocation2]   ;;  %s157_s0 = inlined_call_operand.vmem [shape: f32[1,287], index: 0, kind: input, shape index: {}]   ;;  %s158_s1 = inlined_call_operand.hbm [shape: f32[8,287], index: 1, kind: input, shape index: {}]   ;;  %s159_s2 = inlined_call_operand.vmem [shape: f32[8,1], index: 2, kind: input, shape index: {}]   ;;  %s160_s3 = inlined_call_operand.vmem [shape: f32[8,1], index: 3, kind: output, shape index: {}]  }
   0x1   :  { %s17_s13 = sshll.u32 %s112_s12, 4  ;;  %s88_s16 = scalar_lea.hbm %s158_s1, 384  ;;  %s18_s13 = int_to_ptr.vmem [resolvable:$true] %s17_s13 }
   0x2   :  { %p89_p0 = scmp.ne.s32.totalorder %s158_s1, %s88_s16  ;;  %p92_p1 = scmp.lt.u32.totalorder %s88_s16, %s158_s1 }
   0x4   :  { %p94_p2 = pnand %p92_p1, %p89_p0 }
   0x6   :  { %97 = shalt.err (!%p94_p2)
}
   0x7   :  { %s98_s21 = scalar_lea.vmem %s18_s13, 384  ;;  %p103_p4 = scmp.lt.s32.totalorder %s18_s13, %s18_s13 }
   0x8   :  { %p99_p3 = scmp.ne.s32.totalorder %s18_s13, %s98_s21  ;;  %p104_p5 = scmp.lt.s32.totalorder %s98_s21, %s98_s21 }
   0xa   :  { %p105_p6 = por %p104_p5, %p103_p4 }
   0xc   :  { %p106_p7 = pnand %p105_p6, %p99_p3 }
   0xe   :  { %109 = shalt.err (!%p106_p7)
}
   0xf   :  { %20 = dma.hbm_to_vmem [thread:$0]  %s158_s1, 384, %s18_s13, [#allocation3]  }
  0x10   :  { %110 = dma.done.wait [#allocation3], 384  }
  0x11   :  { %111 = vsyncadd [#allocation3], 4294966912  ;;  %v31_v0 = vlaneseq  ;;  %v26_v5 = vld [vmem:[#allocation2] sm:$0xff]  ;;  %v27_v6 = vld [vmem:[#allocation2 + $0x8] sm:$0xff]  ;;  %vm50_vm0 = vcmask 252928   ;;  %vm57_vm1 = vcmask 7168  }
  0x12   :  { %v28_v7 = vld [vmem:[#allocation2 + $0x10] sm:$0xff]  ;;  %v29_v8 = vld [vmem:[%s157_s0] sm:$0x7] }
  0x13   :  { %v32_v1 = vshrl.u32 %v31_v0, 7  ;;  %v55_v18 = vld [vmem:[%s159_s2] sm:$0xff] }
  0x15   :  { %v33_v2 = vsub.s32 0, %v32_v1  ;;  %v37_v3 = vsub.s32 1, %v32_v1  ;;  %v41_v4 = vsub.s32 2, %v32_v1 }
  0x17   :  { %v34_v9 = vrot.slane %v29_v8, %v33_v2  ;;  %v38_v10 = vrot.slane %v29_v8, %v37_v3  ;;  %v42_v11 = vrot.slane %v29_v8, %v41_v4 }
  0x19   :  { %v46_v12 = vmul.f32 %v34_v9, %v26_v5  ;;  %v47_v13 = vmul.f32 %v38_v10, %v27_v6  ;;  %v48_v14 = vmul.f32 %v42_v11, %v28_v7 }
  0x1b   :  { %v49_v15 = vadd.f32 %v47_v13, %v46_v12  ;;  %v51_v16 = vsel %vm50_vm0, %v48_v14, 0.0 }
  0x1d   :  { %v52_v17 = vadd.f32 %v51_v16, %v49_v15 }
  0x1f   :  { %53 = vadd.xlane.f32.xlu0 %v52_v17 }
  0xac   :  { %v54_v19 = vpop.xlane.xlu0 %53 }
  0xad   :  { %v56_v20 = vadd.f32 %v55_v18, %v54_v19 }
  0xaf   :  { %v58_v21 = vsel %vm57_vm1, %v56_v20, -inf }
  0xb0   :  { %v59_v22 = vrot.slane %v58_v21, 4 }
  0xb2   :  { %v60_v23 = vmax.f32 %v58_v21, %v59_v22 }
  0xb4   :  { %v61_v24 = vrot.slane %v60_v23, 2 }
  0xb6   :  { %v62_v25 = vmax.f32 %v60_v23, %v61_v24 }
  0xb8   :  { %v63_v26 = vrot.slane %v62_v25, 1 }
  0xba   :  { %v64_v27 = vmax.f32 %v62_v25, %v63_v26 }
  0xbc   :  { %v65_v28 = vsub.f32 %v56_v20, %v64_v27 }
  0xbe   :  { %v66_v29 = vmul.f32 1.442695, %v65_v28 }
  0xc0   :  { %84 = vpow2.f32 %v66_v29 }
  0xca   :  { %v85_v30 = vpop.eup %84 }
  0xcb   :  { %v68_v31 = vsel %vm57_vm1, %v85_v30, 0.0 }
  0xcc   :  { %v69_v32 = vrot.slane %v68_v31, 4 }
  0xce   :  { %v70_v33 = vadd.f32 %v69_v32, %v68_v31 }
  0xd0   :  { %v71_v34 = vrot.slane %v70_v33, 2 }
  0xd2   :  { %v72_v35 = vadd.f32 %v71_v34, %v70_v33 }
  0xd4   :  { %v73_v36 = vrot.slane %v72_v35, 1 }
  0xd6   :  { %v74_v37 = vadd.f32 %v73_v36, %v72_v35 }
  0xd8   :  { %86 = vrcp.f32 %v74_v37 }
  0xe2   :  { %v87_v38 = vpop.eup %86 }
  0xe3   :  { %v76_v39 = vmul.f32 %v87_v38, %v85_v30 }
  0xe5   :  { %77 = vst.msk [vmem:[%s160_s3] sm:$0xff] %vm57_vm1, %v76_v39 }
  0xe6   :  { %82 = vsyncpa [#allocation3], 1 }

</bundles_post_ra>
